<compile_context>
chip_gen: v7x
topology: tpu7x:2x2x1
jax: 0.10.0
libtpu: 0.0.40
codegen_flags: <defaults>
</compile_context>

<pallas_src>
import math
from functools import partial

import jax
import jax.numpy as jnp
from jax.experimental import pallas as pl
from jax.experimental.pallas import tpu as pltpu


# ----------------------------- Pallas kernel -------------------------------

def _rmsnorm_kernel(x_ref, w_ref, o_ref, *, eps):
    # x_ref: (TM, D) tile of rows; w_ref: (1, D) weight (broadcast over rows).
    # Statistics are computed in f32 regardless of input dtype; the final
    # result is cast back to the input dtype (identical to PyTorch for f32).
    x = x_ref[...].astype(jnp.float32)
    ms = jnp.mean(x * x, axis=-1, keepdims=True)
    inv = jax.lax.rsqrt(ms + eps)
    w = w_ref[...].astype(jnp.float32)
    # NOTE: adjacent elementwise ops (residual add, cast for the next matmul)
    # could be fused here for free — they ride in spare VALU/EUP slots and
    # remove whole HBM passes elsewhere in the model.
    o_ref[...] = (x * inv * w).astype(o_ref.dtype)


# ----------------------------- tiling helpers --------------------------------

_ROW_TILE_CANDIDATES = (4096, 2048, 1024, 512, 256, 128, 64, 32, 16, 8)


def _vmem_budgets():
    """Generation-aware (tile_budget_bytes, scoped_vmem_limit_bytes)."""
    cap = None
    try:
        cap = int(pltpu.get_tpu_info().vmem_capacity_bytes)
    except Exception:
        cap = None
    mib = 1024 * 1024
    if cap is not None and cap >= 100 * mib:
        # v5e / v6e: 128 MiB physical VMEM per TensorCore — go big.
        return 56 * mib, 100 * mib
    if cap is not None:
        # v7x: 64 MiB physical VMEM — leave headroom for compiler scratch.
        return 36 * mib, 48 * mib
    # Unknown chip: conservative settings that fit every generation.
    return 24 * mib, 48 * mib


def _tile_bytes(t, d, itemsize):
    # double-buffered input tile + double-buffered output tile
    # + f32 working set (x.astype(f32) tile + fused product chain)
    # + double-buffered (1, d) weight.
    return 4 * t * d * itemsize + 2 * t * d * 4 + 2 * d * 4


def _choose_row_tile(m, d, itemsize, budget):
    """Largest row tile (multiple of 8) whose working set fits the budget."""
    m_rounded = max(8, pl.cdiv(m, 8) * 8)
    # TODO(synk): if even an 8-row tile overflows VMEM (absurdly large d_model),
    # the feature dim would also need tiling (two-pass reduction); not needed
    # for realistic d_model.
    tm = 8
    for t in _ROW_TILE_CANDIDATES:
        if t <= m_rounded and _tile_bytes(t, d, itemsize) <= budget:
            tm = t
            break
    # Keep >= 4 grid steps when there is enough work: each v7x TensorCore then
    # runs >= 2 steps, so double-buffering overlaps DMA with compute/writeback.
    while tm > 8 and pl.cdiv(m, tm) < 4:
        tm //= 2
    return tm


# ----------------------------- wrapper --------------------------------------

def pallas_rmsnorm(x, weight, eps=1e-5):
    """RMSNorm over the last axis of `x`, scaled by `weight` (shape (d_model,))."""
    orig_shape = x.shape
    d = orig_shape[-1]
    m = math.prod(orig_shape[:-1]) if len(orig_shape) > 1 else 1
    x2 = x.reshape(m, d)
    w2 = weight.reshape(1, d)

    budget, vmem_limit = _vmem_budgets()
    tm = _choose_row_tile(m, d, x.dtype.itemsize, budget)

    # No padding: Pallas handles the ragged last block (reads of the extra
    # rows are harmless for this per-row op; their stores are masked).
    grid = (pl.cdiv(m, tm),)

    # NOTE: if d_model % 128 != 0 the output stores become masked vst.msk;
    # callers with arbitrary d_model should pad the feature dim (and weight)
    # to a multiple of 128 for lane-dense stores.
    out = pl.pallas_call(
        partial(_rmsnorm_kernel, eps=eps),
        out_shape=jax.ShapeDtypeStruct((m, d), x.dtype),
        grid=grid,
        in_specs=[pl.BlockSpec((tm, d), lambda i: (i, 0)),
                  pl.BlockSpec((1, d), lambda i: (0, 0))],
        out_specs=pl.BlockSpec((tm, d), lambda i: (i, 0)),
        compiler_params=pltpu.CompilerParams(
            dimension_semantics=("parallel",),
            vmem_limit_bytes=vmem_limit),
    )(x2, w2)

    return out.reshape(orig_shape)


# ----------------------------- main ------------------------------------------

if __name__ == "__main__":
    eps = 1e-5
    key = jax.random.PRNGKey(0)
    kx, kw, kx2 = jax.random.split(key, 3)

    def ref_rmsnorm(x, w):
        return x * jax.lax.rsqrt(jnp.mean(x * x, axis=-1, keepdims=True) + eps) * w

    fwd = jax.jit(partial(pallas_rmsnorm, eps=eps))

    # Case 1: small shapes consistent with the module: (batch, seq, d_model).
    B, L, D = 2, 64, 256
    x = jax.random.normal(kx, (B, L, D), jnp.float32)
    weight = 1.0 + 0.1 * jax.random.normal(kw, (D,), jnp.float32)
    out = jax.block_until_ready(fwd(x, weight))
    ref = ref_rmsnorm(x, weight)
    assert out.shape == x.shape
    assert bool(jnp.all(jnp.isfinite(out)))
    assert bool(jnp.allclose(out, ref, atol=1e-5, rtol=1e-5))

    # Case 2: row count not divisible by the tile -> exercises the ragged
    # (un-padded) last block path with masked stores.
    B2, L2 = 3, 50
    x2 = jax.random.normal(kx2, (B2, L2, D), jnp.float32)
    out2 = jax.block_until_ready(fwd(x2, weight))
    ref2 = ref_rmsnorm(x2, weight)
    assert out2.shape == x2.shape
    assert bool(jnp.all(jnp.isfinite(out2)))
    assert bool(jnp.allclose(out2, ref2, atol=1e-5, rtol=1e-5))

    print("KERNEL_OK")
</pallas_src>

<mosaic_0001>
module attributes {stable_mosaic.version = 11 : i64} {
  func.func @_rmsnorm_kernel(%arg0: i32, %arg1: memref<32x256xf32, #tpu.memory_space<vmem>>, %arg2: memref<1x256xf32, #tpu.memory_space<vmem>>, %arg3: memref<32x256xf32, #tpu.memory_space<vmem>>) attributes {dimension_semantics = [#tpu.dimension_semantics<parallel>], iteration_bounds = array<i64: 4>, scalar_prefetch = 0 : i64, scratch_operands = 0 : i64, tpu.core_type = #tpu.core_type<tc>, window_params = [{transform_indices = @transform_0, window_bounds = array<i64: 32, 256>}, {pipeline_mode = #tpu.pipeline_mode<synchronous>, transform_indices = @transform_1, window_bounds = array<i64: 1, 256>}, {transform_indices = @transform_2, window_bounds = array<i64: 32, 256>}]} {
    %c0 = arith.constant 0 : index
    %c0_0 = arith.constant 0 : index
    %0 = vector.load %arg1[%c0, %c0_0] : memref<32x256xf32, #tpu.memory_space<vmem>>, vector<32x256xf32>
    %1 = arith.mulf %0, %0 : vector<32x256xf32>
    %cst = arith.constant dense<0.000000e+00> : vector<32xf32>
    %2 = vector.multi_reduction <add>, %1, %cst [1] : vector<32x256xf32> to vector<32xf32>
    %3 = vector.shape_cast %2 : vector<32xf32> to vector<32x1xf32>
    %cst_1 = arith.constant 2.560000e+02 : f32
    %4 = vector.broadcast %cst_1 : f32 to vector<32x1xf32>
    %5 = arith.divf %3, %4 : vector<32x1xf32>
    %cst_2 = arith.constant 9.99999974E-6 : f32
    %6 = vector.broadcast %cst_2 : f32 to vector<32x1xf32>
    %7 = arith.addf %5, %6 : vector<32x1xf32>
    %8 = math.rsqrt %7 : vector<32x1xf32>
    %c0_3 = arith.constant 0 : index
    %c0_4 = arith.constant 0 : index
    %9 = vector.load %arg2[%c0_3, %c0_4] : memref<1x256xf32, #tpu.memory_space<vmem>>, vector<1x256xf32>
    %10 = vector.broadcast %8 : vector<32x1xf32> to vector<32x256xf32>
    %11 = arith.mulf %0, %10 : vector<32x256xf32>
    %12 = vector.broadcast %9 : vector<1x256xf32> to vector<32x256xf32>
    %13 = arith.mulf %11, %12 : vector<32x256xf32>
    %c0_5 = arith.constant 0 : index
    %c0_6 = arith.constant 0 : index
    %14 = vector.load %arg3[%c0_5, %c0_6] : memref<32x256xf32, #tpu.memory_space<vmem>>, vector<32x256xf32>
    tpu.vector_store %arg3[%c0_5, %c0_6], %13 {strides = array<i32>} : memref<32x256xf32, #tpu.memory_space<vmem>>, vector<32x256xf32>,
    return
  }
  func.func @transform_0(%arg0: i32) -> (i32, i32) {
    %c0_i32 = arith.constant 0 : i32
    %c0_i32_0 = arith.constant 0 : i32
    return %arg0, %c0_i32 : i32, i32
  }
  func.func @transform_1(%arg0: i32) -> (i32, i32) {
    %c0_i32 = arith.constant 0 : i32
    %c0_i32_0 = arith.constant 0 : i32
    %c0_i32_1 = arith.constant 0 : i32
    return %c0_i32, %c0_i32_0 : i32, i32
  }
  func.func @transform_2(%arg0: i32) -> (i32, i32) {
    %c0_i32 = arith.constant 0 : i32
    %c0_i32_0 = arith.constant 0 : i32
    return %arg0, %c0_i32 : i32, i32
  }
}

</mosaic_0001>

<bundles_post_ra>
// kernel: pallas_rmsnorm.1
= control target key start
LH: loop header
LB: loop body
LE: loop exit
PB: predicated region body
PF: predicated region fallthrough
CT: control target
= control target key end

     0   :  { %7 = vsyncpa [#allocation3], 0  ;;  %s694_s0 = inlined_call_operand.hbm [shape: f32[128,256], index: 0, kind: input, shape index: {}]   ;;  %s695_s1 = inlined_call_operand.vmem [shape: f32[1,256], index: 1, kind: input, shape index: {}]   ;;  %s696_s2 = inlined_call_operand.hbm [shape: f32[128,256], index: 2, kind: output, shape index: {}]  }
   0x1   :  { %9 = vsyncpa [#allocation3 + $0x1], 0 }
   0x2   :  { %10 = vsyncpa [#allocation4], 0 }
   0x3   :  { %12 = vsyncpa [#allocation4 + $0x1], 0  ;;  %s527_s9 = smov 0   ;;  %s529_s10 = smov 0  }
   0x4   :  { %s531_s11 = smov 0   ;;  %s533_s12 = smov 0  }
   0x5 LB: > { %s548_s13 = sadd.s32 4294967295, %s504_s12   ;;  %s330_s14 = sadd.s32 4294967294, %s504_s12   ;;  %s504_s12 = sphi %s533_s12, %s708_s12   ;;  %s500_s11 = sphi %s531_s11, %s707_s11   ;;  %s496_s10 = sphi %s529_s10, %s706_s10   ;;  %s492_s9 = sphi %s527_s9, %s705_s9  }
   0x6   : > { %s552_s15 = sadd.s32 1, %s504_s12   ;;  %s25_s16 = sadd.s32 1, %s500_s11 }
   0x7   : > { %s22_s17 = ssub.s32 %s504_s12, %s552_s15  ;;  %p32_p0 = scmp.ne.s32.totalorder %s500_s11, %s496_s10 }
   0x8   : > { %p23_p1 = scmp.eq.s32.totalorder %s22_s17, 0  ;;  %p33_p2 = scmp.eq.s32.totalorder %s504_s12, 0 }
   0x9   : > { %p38_p3 = scmp.ne.s32.totalorder %s496_s10, %s492_s9  ;;  %p39_p4 = scmp.eq.s32.totalorder %s548_s13, 0 }
   0xa   : > { %s564_s18 = scalar_select %p23_p1, %s500_s11, %s25_s16  }
   0xb   : > { %p566_p5 = por %p33_p2, %p32_p0  ;;  %p570_p6 = por %p39_p4, %p38_p3 }
   0xc   : > { %p83_p7 = scmp.eq.s32.totalorder %s548_s13, 3  ;;  %p89_p8 = scmp.eq.s32.totalorder %s330_s14, 3 }
   0xd   : > { %p362_p9 = scmp.lt.s32.totalorder %s504_s12, 4  ;;  %s112_s23 = sand.u32 1, %s500_s11  }
   0xe   : > { %p576_p10 = por %p83_p7, %p32_p0  ;;  %p580_p11 = por %p89_p8, %p38_p3 }
   0xf   : > { %s347_s24 = sshll.u32 %s504_s12, 10  ;;  %s333_s25 = sshll.u32 %s112_s23, 6 }
  0x10   : > { %s700_s21 = scalar_select %p576_p10, 1, 0 }
  0x11   : > { %s701_s22 = scalar_select %p580_p11, 1, 0 }
  0x12   : > { %s589_s28 = scalar_lea.hbm %s694_s0, %s347_s24  ;;  %s116_s29 = scalar_lea.vmem [#allocation2], %s333_s25 }
  0x13   : > { %s124_s30 = sshll.u32 %s116_s29, 4  ;;  %p593_p12 = pnand %p362_p9, %p566_p5  ;;  %s597_s30 = int_to_ptr.vmem [resolvable:$true] %s124_s30 }
  0x14   : > { %s599_s4 = scalar_lea.sflag [#allocation3], %s112_s23  ;;  %s408_s5 = scalar_lea.hbm %s589_s28, 1024 }
  0x15   : > { %p409_p13 = scmp.ne.s32.totalorder %s589_s28, %s408_s5  ;;  %p410_p0 = pneg %p593_p12 }
  0x16   : > { %s413_s8 = scalar_lea.hbm %s694_s0, 4096  ;;  %p414_p3 = scmp.lt.u32.totalorder %s589_s28, %s694_s0 }
  0x17   : > { %p411_p1 = pnand %p410_p0, %p409_p13  ;;  %p415_p4 = scmp.lt.u32.totalorder %s413_s8, %s408_s5 }
  0x18   : > { %p417_p7 = scmp.lt.u32.totalorder %s408_s5, %s589_s28 }
  0x19   : > { %p412_p2 = pneg %p411_p1  ;;  %p416_p5 = por %p415_p4, %p414_p3 }
  0x1b   : > { %p418_p8 = por %p417_p7, %p416_p5 }
  0x1d   : > { %p419_p9 = pnand %p418_p8, %p412_p2 }
  0x1f   : > { %422 = shalt.err (!%p419_p9)
}
  0x20   : > { %s423_s17 = scalar_lea.vmem %s597_s30, 1024  ;;  %s506_s19 = smov [#allocation2]  }
  0x21   : > { %p424_p13 = scmp.ne.s32.totalorder %s597_s30, %s423_s17  ;;  %s428_s23 = sshll.u32 %s506_s19, 4  ;;  %s429_s23 = int_to_ptr.vmem [resolvable:$false] %s428_s23 }
  0x22   : > { %s430_s24 = scalar_lea.vmem %s429_s23, 2048  ;;  %p431_p10 = scmp.lt.s32.totalorder %s597_s30, %s429_s23 }
  0x23   : > { %p426_p1 = pnand %p424_p13, %p410_p0  ;;  %p432_p3 = scmp.lt.s32.totalorder %s430_s24, %s423_s17 }
  0x25   : > { %p427_p11 = pneg %p426_p1  ;;  %p433_p4 = por %p432_p3, %p431_p10 }
  0x27   : > { %p434_p5 = pnand %p433_p4, %p427_p11 }
  0x29   : > { %437 = shalt.err (!%p434_p5)
}
  0x2a   : > { %s507_s25 = smov 256   ;;  %s508_s26 = smov 16  }
  0x2b   : > { %357 = dma.hbm_to_vmem [thread:$0]  (!%p593_p12), %s589_s28, 1024, %s597_s30, %s599_s4, %s507_s25, %s507_s25, %s508_s26  }
  0x2c   : > { %p337_p0 = scmp.ge.s32.totalorder %s504_s12, 1  ;;  %p132_p2 = scmp.lt.s32.totalorder %s504_s12, 5 }
  0x2e   : > { %p133_p7 = pnand %p337_p0, %p132_p2 }
  0x2f   : > { %s630_s27 = sand.u32 (!%p133_p7), 1, %s496_s10  }
  0x30   : > { %136 = sbr.rel (%p133_p7) target bundleno = 242 (0xf2), region = 28  ;;  %s338_s29 = sshll.u32 (!%p133_p7), %s630_s27, 6 }
  0x31   : > { %s139_s5 = scalar_lea.sflag (!%p133_p7), [#allocation3], %s630_s27  ;;  %s142_s6 = scalar_lea.vmem (!%p133_p7), [#allocation2], %s338_s29 }
  0x37   : > { %483 = dma.done.wait (%p570_p6), %s139_s5, 1024  }
  0x38   : > { %485 = vsyncadd (%p570_p6), %s139_s5, 4294966272  ;;  %v169_v0 = vld [vmem:[%s142_s6 + $0x20] sm:$0xff]  ;;  %v170_v1 = vld [vmem:[%s142_s6 + $0x28] sm:$0xff]  ;;  %v216_v23 = vlaneseq  ;;  %s349_s30 = sshll.u32 %s548_s13, 10  ;;  %s162_s3 = scalar_lea.vmem [#allocation5], %s338_s29 }
  0x39   : > { %v165_v2 = vld [vmem:[%s142_s6] sm:$0xff]  ;;  %v177_v3 = vmul.f32 %v169_v0, %v169_v0  ;;  %v178_v4 = vmul.f32 %v170_v1, %v170_v1  ;;  %v166_v5 = vld [vmem:[%s142_s6 + $0x8] sm:$0xff]  ;;  %v171_v7 = vld [vmem:[%s142_s6 + $0x30] sm:$0xff]  ;;  %s257_s4 = sshll.u32 %s162_s3, 4  ;;  %s649_s13 = scalar_lea.hbm %s696_s2, %s349_s30  ;;  %s651_s4 = int_to_ptr.vmem [resolvable:$true] %s257_s4 }
  0x3a   : > { %v173_v6 = vmul.f32 %v165_v2, %v165_v2  ;;  %v172_v8 = vld [vmem:[%s142_s6 + $0x38] sm:$0xff]  ;;  %v174_v9 = vmul.f32 %v166_v5, %v166_v5  ;;  %v179_v10 = vmul.f32 %v171_v7, %v171_v7  ;;  %v167_v12 = vld [vmem:[%s142_s6 + $0x10] sm:$0xff]  ;;  %v217_v30 = vshrl.u32 %v216_v23, 7  ;;  %v206_v36 = vld [vmem:[%s695_s1] sm:$0x3]  ;;  %s243_s14 = scalar_lea.sflag [#allocation4], %s630_s27 }
  0x3b   : > { %v180_v11 = vmul.f32 %v172_v8, %v172_v8  ;;  %v168_v13 = vld [vmem:[%s142_s6 + $0x18] sm:$0xff]  ;;  %v187_v14 = vadd.f32 %v178_v4, %v177_v3  ;;  %v175_v15 = vmul.f32 %v167_v12, %v167_v12  ;;  %s438_s16 = scalar_lea.vmem %s651_s4, 1024  ;;  %p703_p10 = scmp.ne.s32.totalorder %s700_s21, 0 }
  0x3c   : > { %v176_v16 = vmul.f32 %v168_v13, %v168_v13  ;;  %v181_v17 = vadd.f32 %v174_v9, %v173_v6  ;;  %v218_v34 = vsub.s32 0, %v217_v30  ;;  %v222_v35 = vsub.s32 1, %v217_v30  ;;  %p439_p6 = scmp.ne.s32.totalorder %s651_s4, %s438_s16  ;;  %s509_s17 = smov [#allocation5]  }
  0x3d   : > { %188 = vadd.xlane.f32.xlu1 %v187_v14  ;;  %v190_v18 = vadd.f32 %v180_v11, %v179_v10  ;;  %s442_s19 = sshll.u32 %s509_s17, 4  ;;  %s443_s19 = int_to_ptr.vmem [resolvable:$false] %s442_s19 }
  0x3e   : > { %182 = vadd.xlane.f32.xlu0 %v181_v17  ;;  %v184_v19 = vadd.f32 %v176_v16, %v175_v15  ;;  %v219_v37 = vrot.slane %v206_v36, %v218_v34  ;;  %v223_v38 = vrot.slane %v206_v36, %v222_v35  ;;  %p440_p11 = pnand %p439_p6, %p703_p10  ;;  %s444_s23 = scalar_lea.vmem %s443_s19, 2048 }
  0x3f   : > { %p445_p8 = scmp.lt.s32.totalorder %s651_s4, %s443_s19  ;;  %p446_p9 = scmp.lt.s32.totalorder %s444_s23, %s438_s16 }
  0x40   : > { %p441_p12 = pneg %p440_p11 }
  0x41   : > { %191 = vadd.xlane.f32.xlu1 %v190_v18  ;;  %p447_p13 = por %p446_p9, %p445_p8 }
  0x42   : > { %185 = vadd.xlane.f32.xlu0 %v184_v19 }
  0x43   : > { %p448_p1 = pnand %p447_p13, %p441_p12 }
  0xca   : > { %v189_v20 = vpop.xlane.xlu1 %188 }
  0xcb   : > { %v196_v21 = vmul.f32 0.00390625, %v189_v20  ;;  %v183_v22 = vpop.xlane.xlu0 %182 }
  0xcc   : > { %v194_v24 = vmul.f32 0.00390625, %v183_v22 }
  0xcd   : > { %v200_v25 = vadd.f32 1e-05, %v196_v21 }
  0xce   : > { %v198_v26 = vadd.f32 1e-05, %v194_v24  ;;  %v192_v27 = vpop.xlane.xlu1 %191 }
  0xcf   : > { %400 = vrsqrt.f32 %v200_v25  ;;  %v197_v28 = vmul.f32 0.00390625, %v192_v27  ;;  %v186_v29 = vpop.xlane.xlu0 %185 }
  0xd0   : > { %402 = vrsqrt.f32 %v198_v26  ;;  %v195_v31 = vmul.f32 0.00390625, %v186_v29 }
  0xd1   : > { %v201_v32 = vadd.f32 1e-05, %v197_v28 }
  0xd2   : > { %v199_v33 = vadd.f32 1e-05, %v195_v31 }
  0xd3   : > { %404 = vrsqrt.f32 %v201_v32 }
  0xd4   : > { %406 = vrsqrt.f32 %v199_v33 }
  0xd9   : > { %v401_v39 = vpop.eup %400 }
  0xda   : > { %v403_v40 = vpop.eup %402  ;;  %v211_v41 = vmul.f32 %v401_v39, %v169_v0  ;;  %v212_v42 = vmul.f32 %v401_v39, %v170_v1 }
  0xdb   : > { %v207_v43 = vmul.f32 %v403_v40, %v165_v2  ;;  %v208_v44 = vmul.f32 %v403_v40, %v166_v5 }
  0xdc   : > { %v230_v45 = vmul.f32 %v219_v37, %v211_v41  ;;  %v231_v46 = vmul.f32 %v223_v38, %v212_v42 }
  0xdd   : > { %v405_v47 = vpop.eup %404  ;;  %v226_v48 = vmul.f32 %v219_v37, %v207_v43  ;;  %v227_v49 = vmul.f32 %v223_v38, %v208_v44 }
  0xde   : > { %v407_v50 = vpop.eup %406  ;;  %238 = vst [vmem:[%s162_s3 + $0x20] sm:$0xff] %v230_v45  ;;  %239 = vst [vmem:[%s162_s3 + $0x28] sm:$0xff] %v231_v46  ;;  %v213_v51 = vmul.f32 %v405_v47, %v171_v7  ;;  %v214_v52 = vmul.f32 %v405_v47, %v172_v8 }
  0xdf   : > { %234 = vst [vmem:[%s162_s3] sm:$0xff] %v226_v48  ;;  %235 = vst [vmem:[%s162_s3 + $0x8] sm:$0xff] %v227_v49  ;;  %v209_v53 = vmul.f32 %v407_v50, %v167_v12  ;;  %v210_v54 = vmul.f32 %v407_v50, %v168_v13 }
  0xe0   : > { %v232_v55 = vmul.f32 %v219_v37, %v213_v51  ;;  %v233_v56 = vmul.f32 %v223_v38, %v214_v52 }
  0xe1   : > { %v228_v57 = vmul.f32 %v219_v37, %v209_v53  ;;  %v229_v58 = vmul.f32 %v223_v38, %v210_v54 }
  0xe2   : > { %240 = vst [vmem:[%s162_s3 + $0x30] sm:$0xff] %v232_v55  ;;  %241 = vst [vmem:[%s162_s3 + $0x38] sm:$0xff] %v233_v56 }
  0xe3   : > { %236 = vst [vmem:[%s162_s3 + $0x10] sm:$0xff] %v228_v57  ;;  %237 = vst [vmem:[%s162_s3 + $0x18] sm:$0xff] %v229_v58 }
  0xe4   : > { %451 = shalt.err (!%p448_p1)
}
  0xe5   : > { %s452_s24 = scalar_lea.hbm %s649_s13, 1024  ;;  %s456_s29 = scalar_lea.hbm %s696_s2, 4096 }
  0xe6   : > { %p453_p3 = scmp.ne.s32.totalorder %s649_s13, %s452_s24  ;;  %p457_p0 = scmp.lt.u32.totalorder %s649_s13, %s696_s2 }
  0xe7   : > { %p458_p2 = scmp.lt.u32.totalorder %s456_s29, %s452_s24  ;;  %p460_p6 = scmp.lt.u32.totalorder %s452_s24, %s649_s13 }
  0xe8   : > { %p454_p4 = pnand %p453_p3, %p703_p10 }
  0xe9   : > { %p459_p7 = por %p458_p2, %p457_p0 }
  0xea   : > { %p455_p5 = pneg %p454_p4 }
  0xeb   : > { %p461_p11 = por %p460_p6, %p459_p7 }
  0xed   : > { %p462_p12 = pnand %p461_p11, %p455_p5 }
  0xef   : > { %465 = shalt.err (!%p462_p12)
}
  0xf0   : > { %s510_s20 = smov 256   ;;  %s511_s28 = smov 16  }
  0xf1   : > { %352 = dma.vmem_to_hbm [thread:$0]  (%p703_p10), %s651_s4, 1024, %s649_s13, %s243_s14, %s510_s20, %s510_s20, %s511_s28  }
  0xf2 PF: > { %p363_p8 = scmp.ge.s32.totalorder %s504_s12, 2  ;;  %s272_s30 = sand.u32 1, %s492_s9  }
  0xf3   : > { %p704_p9 = scmp.ne.s32.totalorder %s701_s22, 0  ;;  %s273_s3 = scalar_lea.sflag [#allocation4], %s272_s30 }
  0xf5   : > { %p359_p13 = pnand %p363_p8, %p704_p9 }
  0xf7   : > { %487 = dma.done.wait (!%p359_p13), %s273_s3, 1024  }
  0xf8   : > { %489 = vsyncadd (!%p359_p13), %s273_s3, 4294966272  ;;  %p15_p1 = scmp.ge.s32.totalorder %s552_s15, 6   ;;  %s705_s9 = smov %s496_s10 }
  0xf9   : > { %s706_s10 = smov %s500_s11  ;;  %s707_s11 = smov %s564_s18 }
  0xfa   : > { %s708_s12 = smov %s552_s15  ;;  %17 = sbr.rel (!%p15_p1) target bundleno = 5 (0x5), region = 73 }
 0x101   :  { %278 = vsyncpa [#allocation3], 1 }
 0x102   :  { %280 = vsyncpa [#allocation3 + $0x1], 1 }
 0x103   :  { %281 = vsyncpa [#allocation4], 1 }
 0x104   :  { %283 = vsyncpa [#allocation4 + $0x1], 1 }

</bundles_post_ra>
